<compile_context>
chip_gen: v7x
topology: tpu7x:2x2x1
jax: 0.10.0
libtpu: 0.0.40
codegen_flags: <defaults>
</compile_context>

<pallas_src>
import math
import jax
import jax.numpy as jnp
from jax import lax
from jax.experimental import pallas as pl
from jax.experimental.pallas import tpu as pltpu

LANE = 128


def _round_up(n, m):
    return ((n + m - 1) // m) * m


def clusternet_kernel(x_ref, w1_ref, b1_ref, w2_ref, b2_ref, o_ref):
    # In-kernel bf16 cast of the streamed activations (VPU work hidden under
    # the DMA); fc1 runs on the MXU with f32 accumulate.
    x = x_ref[...].astype(jnp.bfloat16)
    h = jnp.dot(x, w1_ref[...], preferred_element_type=jnp.float32)
    # Bias + ReLU in f32 on the VPU (padded hidden lanes stay exactly 0).
    h = jnp.maximum(h + b1_ref[...], 0.0)
    # Output layer (single unit): contract H with w2 as a (1, h_pad) x
    # (tb, h_pad)^T MXU pass -> lane-dense (1, tb) row (no masked column
    # stores, no XLU cross-lane reduce competing with vmatmul).
    y = lax.dot_general(w2_ref[...], h,
                        dimension_numbers=(((1,), (1,)), ((), ())),
                        preferred_element_type=jnp.float32)
    o_ref[...] = (y + b2_ref[0]).reshape(o_ref.shape)


def prepare_params(w1, b1, w2, b2):
    """Pad/cast the (tiny) parameters once, outside the per-call path."""
    d_in, H = w1.shape
    assert w2.shape == (H, 1)
    h_pad = _round_up(H, LANE)
    w1_p = jnp.zeros((d_in, h_pad), jnp.bfloat16).at[:, :H].set(
        w1.astype(jnp.bfloat16))
    b1_p = jnp.zeros((1, h_pad), jnp.float32).at[0, :H].set(
        b1.astype(jnp.float32))
    w2_p = jnp.zeros((1, h_pad), jnp.float32).at[0, :H].set(
        w2.reshape(H).astype(jnp.float32))
    b2_s = b2.reshape(1).astype(jnp.float32)
    return w1_p, b1_p, w2_p, b2_s


def clusternet_forward(x, params, *, tile_b=2048):
    """ClusterNet forward: relu(x @ w1 + b1) @ w2 + b2, returned as (B, 1)."""
    w1_p, b1_p, w2_p, b2_s = params
    B, d_in = x.shape
    assert w1_p.shape[0] == d_in
    h_pad = w1_p.shape[1]

    # Batch tile: multiple of 128 (lane-dense output rows); when the batch is
    # large, keep at least 2 grid steps so both v7x TensorCores get work.
    if B <= tile_b:
        tb = _round_up(max(B, 1), LANE)
    else:
        tb = min(_round_up(tile_b, LANE), _round_up((B + 1) // 2, LANE))
    b_pad = _round_up(B, tb)
    n_tiles = b_pad // tb
    grid = (n_tiles,)

    # Only pad the batch (same dtype, no feature pad, no cast); zero-copy when
    # B is already a multiple of the tile. Padded rows are sliced off below.
    if b_pad != B:
        x_in = jnp.zeros((b_pad, d_in), x.dtype).at[:B].set(x)
    else:
        x_in = x

    cost = pl.CostEstimate(
        flops=2 * b_pad * d_in * h_pad + 2 * b_pad * h_pad,
        transcendentals=0,
        bytes_accessed=b_pad * d_in * x_in.dtype.itemsize + b_pad * 4
        + w1_p.size * 2 + (b1_p.size + w2_p.size + b2_s.size) * 4,
    )

    out = pl.pallas_call(
        clusternet_kernel,
        out_shape=jax.ShapeDtypeStruct((n_tiles, 1, tb), jnp.float32),
        grid=grid,
        in_specs=[
            # Activation stream: one raw (tb, d_in) tile per grid step.
            # TODO(synk): if the trace still shows exposed DMA at large tiles,
            # add pipeline_mode=pl.Buffered(3) on this spec only.
            pl.BlockSpec((tb, d_in), lambda i: (i, 0)),
            # Weights / biases: constant index_map -> loaded once, VMEM-resident.
            pl.BlockSpec((d_in, h_pad), lambda i: (0, 0)),
            pl.BlockSpec((1, h_pad), lambda i: (0, 0)),
            pl.BlockSpec((1, h_pad), lambda i: (0, 0)),
            # b2: scalar in SMEM (no VMEM stream / DMA descriptor per tile).
            pl.BlockSpec(memory_space=pltpu.MemorySpace.SMEM),
        ],
        # Lane-dense output row per tile.
        out_specs=pl.BlockSpec((1, 1, tb), lambda i: (i, 0, 0)),
        compiler_params=pltpu.CompilerParams(
            dimension_semantics=("parallel",)),
        cost_estimate=cost,
    )(x_in, w1_p, b1_p, w2_p, b2_s)

    # (n_tiles, 1, tb) -> (B, 1), dropping batch padding.
    return out.reshape(b_pad)[:B].reshape(B, 1)


def init_params(key, state_dim, action_dim, hidden_dim=100, init_w=0.1):
    """Deterministic re-implementation of ClusterNet.__init__ parameter init."""
    d_in = state_dim + action_dim
    k1, k2, k3, k4 = jax.random.split(key, 4)

    # fc1.weight: fanin_init with fanin = weight.size(0) = hidden_dim
    # (replicates the PyTorch code's quirk).
    v1 = 1.0 / math.sqrt(hidden_dim)
    w1_t = jax.random.uniform(k1, (hidden_dim, d_in), jnp.float32, -v1, v1)
    # fc1.bias: default nn.Linear init uniform(-1/sqrt(in), 1/sqrt(in))
    vb1 = 1.0 / math.sqrt(d_in)
    b1 = jax.random.uniform(k2, (hidden_dim,), jnp.float32, -vb1, vb1)

    # out.weight: normal_(-init_w, init_w) -> N(mean=-init_w, std=init_w),
    # exactly as in the PyTorch source.
    w2_t = -init_w + init_w * jax.random.normal(k3, (1, hidden_dim), jnp.float32)
    # out.bias: default nn.Linear init uniform(-1/sqrt(hidden), 1/sqrt(hidden))
    vb2 = 1.0 / math.sqrt(hidden_dim)
    b2 = jax.random.uniform(k4, (1,), jnp.float32, -vb2, vb2)

    # Pre-transposed for the x @ W layout used by the kernel.
    return w1_t.T, b1, w2_t.T, b2


if __name__ == "__main__":
    STATE_DIM, ACTION_DIM, HIDDEN_DIM = 24, 8, 32
    BATCH = 8

    key = jax.random.PRNGKey(0)
    kx, kp = jax.random.split(key)

    x = jax.random.normal(kx, (BATCH, STATE_DIM + ACTION_DIM), jnp.float32)
    w1, b1, w2, b2 = init_params(kp, STATE_DIM, ACTION_DIM, HIDDEN_DIM)

    params = prepare_params(w1, b1, w2, b2)   # padded once, reused per call
    out = clusternet_forward(x, params)
    jax.block_until_ready(out)
    assert out.shape == (BATCH, 1)

    # Reference with the same bf16 first-layer operands (tight tolerance).
    h_ref = jnp.maximum(
        jnp.dot(x.astype(jnp.bfloat16), w1.astype(jnp.bfloat16),
                preferred_element_type=jnp.float32) + b1[None, :], 0.0)
    ref_bf16 = h_ref @ w2 + b2[None, :]
    assert jnp.allclose(out, ref_bf16, atol=1e-4, rtol=1e-4)

    # Full-f32 reference (loose tolerance for the bf16 matmul operands).
    ref_f32 = jnp.maximum(x @ w1 + b1[None, :], 0.0) @ w2 + b2[None, :]
    assert jnp.allclose(out, ref_f32, atol=2e-2, rtol=2e-2)

    print("KERNEL_OK")
</pallas_src>

<mosaic_0001>
module attributes {stable_mosaic.version = 11 : i64} {
  func.func @clusternet_kernel(%arg0: i32, %arg1: memref<128x32xf32, #tpu.memory_space<vmem>>, %arg2: memref<32x128xbf16, #tpu.memory_space<vmem>>, %arg3: memref<1x128xf32, #tpu.memory_space<vmem>>, %arg4: memref<1x128xf32, #tpu.memory_space<vmem>>, %arg5: memref<1xf32, #tpu.memory_space<smem>>, %arg6: memref<1x1x128xf32, #tpu.memory_space<vmem>>) attributes {dimension_semantics = [#tpu.dimension_semantics<parallel>], iteration_bounds = array<i64: 1>, scalar_prefetch = 0 : i64, scratch_operands = 0 : i64, tpu.core_type = #tpu.core_type<tc>, window_params = [{transform_indices = @transform_0, window_bounds = array<i64: 128, 32>}, {pipeline_mode = #tpu.pipeline_mode<synchronous>, transform_indices = @transform_1, window_bounds = array<i64: 32, 128>}, {pipeline_mode = #tpu.pipeline_mode<synchronous>, transform_indices = @transform_2, window_bounds = array<i64: 1, 128>}, {pipeline_mode = #tpu.pipeline_mode<synchronous>, transform_indices = @transform_3, window_bounds = array<i64: 1, 128>}, {transform_indices = @transform_4, window_bounds = array<i64: 1>}, {transform_indices = @transform_5, window_bounds = array<i64: 1, 1, 128>}]} {
    %c0 = arith.constant 0 : index
    %c0_0 = arith.constant 0 : index
    %0 = vector.load %arg1[%c0, %c0_0] : memref<128x32xf32, #tpu.memory_space<vmem>>, vector<128x32xf32>
    %1 = arith.truncf %0 : vector<128x32xf32> to vector<128x32xbf16>
    %c0_1 = arith.constant 0 : index
    %c0_2 = arith.constant 0 : index
    %2 = vector.load %arg2[%c0_1, %c0_2] : memref<32x128xbf16, #tpu.memory_space<vmem>>, vector<32x128xbf16>
    %cst = arith.constant dense<0.000000e+00> : vector<128x128xf32>
    %3 = tpu.matmul %1, %2, %cst {dimension_numbers = #tpu.dot_dimension_numbers<[1], [0], [0], [1], [0, 0, 1, 1], [], []>} : vector<128x32xbf16>, vector<32x128xbf16>, vector<128x128xf32> -> vector<128x128xf32>
    %c0_3 = arith.constant 0 : index
    %c0_4 = arith.constant 0 : index
    %4 = vector.load %arg3[%c0_3, %c0_4] : memref<1x128xf32, #tpu.memory_space<vmem>>, vector<1x128xf32>
    %5 = vector.broadcast %4 : vector<1x128xf32> to vector<128x128xf32>
    %6 = arith.addf %3, %5 : vector<128x128xf32>
    %cst_5 = arith.constant 0.000000e+00 : f32
    %7 = vector.broadcast %cst_5 : f32 to vector<128x128xf32>
    %8 = arith.maximumf %6, %7 : vector<128x128xf32>
    %c0_6 = arith.constant 0 : index
    %c0_7 = arith.constant 0 : index
    %9 = vector.load %arg4[%c0_6, %c0_7] : memref<1x128xf32, #tpu.memory_space<vmem>>, vector<1x128xf32>
    %cst_8 = arith.constant dense<0.000000e+00> : vector<1x128xf32>
    %10 = tpu.matmul %9, %8, %cst_8 {dimension_numbers = #tpu.dot_dimension_numbers<[1], [1], [0], [0], [0, 0, 1, 0], [], []>} : vector<1x128xf32>, vector<128x128xf32>, vector<1x128xf32> -> vector<1x128xf32>
    %c0_9 = arith.constant 0 : index
    %11 = memref.load %arg5[%c0_9] : memref<1xf32, #tpu.memory_space<smem>>
    %12 = vector.broadcast %11 : f32 to vector<1x128xf32>
    %13 = arith.addf %10, %12 : vector<1x128xf32>
    %14 = vector.shape_cast %13 : vector<1x128xf32> to vector<1x1x128xf32>
    %c0_10 = arith.constant 0 : index
    %c0_11 = arith.constant 0 : index
    %c0_12 = arith.constant 0 : index
    %15 = vector.load %arg6[%c0_10, %c0_11, %c0_12] : memref<1x1x128xf32, #tpu.memory_space<vmem>>, vector<1x1x128xf32>
    tpu.vector_store %arg6[%c0_10, %c0_11, %c0_12], %14 {strides = array<i32>} : memref<1x1x128xf32, #tpu.memory_space<vmem>>, vector<1x1x128xf32>,
    return
  }
  func.func @transform_0(%arg0: i32) -> (i32, i32) {
    %c0_i32 = arith.constant 0 : i32
    %c0_i32_0 = arith.constant 0 : i32
    return %arg0, %c0_i32 : i32, i32
  }
  func.func @transform_1(%arg0: i32) -> (i32, i32) {
    %c0_i32 = arith.constant 0 : i32
    %c0_i32_0 = arith.constant 0 : i32
    %c0_i32_1 = arith.constant 0 : i32
    return %c0_i32, %c0_i32_0 : i32, i32
  }
  func.func @transform_2(%arg0: i32) -> (i32, i32) {
    %c0_i32 = arith.constant 0 : i32
    %c0_i32_0 = arith.constant 0 : i32
    %c0_i32_1 = arith.constant 0 : i32
    return %c0_i32, %c0_i32_0 : i32, i32
  }
  func.func @transform_3(%arg0: i32) -> (i32, i32) {
    %c0_i32 = arith.constant 0 : i32
    %c0_i32_0 = arith.constant 0 : i32
    %c0_i32_1 = arith.constant 0 : i32
    return %c0_i32, %c0_i32_0 : i32, i32
  }
  func.func @transform_4(%arg0: i32) -> i32 {
    %c0_i32 = arith.constant 0 : i32
    %c0_i32_0 = arith.constant 0 : i32
    return %c0_i32 : i32
  }
  func.func @transform_5(%arg0: i32) -> (i32, i32, i32) {
    %c0_i32 = arith.constant 0 : i32
    %c0_i32_0 = arith.constant 0 : i32
    %c0_i32_1 = arith.constant 0 : i32
    return %arg0, %c0_i32, %c0_i32_0 : i32, i32, i32
  }
}

</mosaic_0001>

<bundles_post_ra>
// kernel: tpu_custom_call.1
= control target key start
LH: loop header
LB: loop body
LE: loop exit
PB: predicated region body
PF: predicated region fallthrough
CT: control target
= control target key end

     0   :  { %vm70_vm0 = vcmask 261120   ;;  %s568_s0 = inlined_call_operand.vmem [shape: f32[128,32], index: 0, kind: input, shape index: {}]   ;;  %s569_s1 = inlined_call_operand.vmem [shape: bf16[32,128], index: 1, kind: input, shape index: {}]   ;;  %s570_s2 = inlined_call_operand.vmem [shape: f32[1,128], index: 2, kind: input, shape index: {}]   ;;  %s571_s3 = inlined_call_operand.vmem [shape: f32[1,128], index: 3, kind: input, shape index: {}]   ;;  %s572_s4 = inlined_call_operand.<no memory space> [shape: f32[1], index: 4, kind: input, shape index: {}]   ;;  %s573_s5 = inlined_call_operand.hbm [shape: f32[1,1,128], index: 5, kind: output, shape index: {}]  }
   0x1   :  { %v417_v0 = vld [vmem:[%s569_s1] sm:$0xff]   ;;  %v418_v1 = vld [vmem:[%s569_s1 + $0x8] sm:$0xff]   ;;  %v25_v5 = vld [vmem:[%s568_s0 + $0x10] sm:$0xff] }
   0x2   :  { %334 = vmatprep.subr.bf16.mxu0 %v417_v0  ;;  %v23_v2 = vld [vmem:[%s568_s0] sm:$0xff]  ;;  %v24_v3 = vld [vmem:[%s568_s0 + $0x8] sm:$0xff]  ;;  %v26_v6 = vld [vmem:[%s568_s0 + $0x18] sm:$0xff] }
   0x3   :  { %335 = vmatpush3.bf16.msra.mxu0 %v417_v0  ;;  %v39_v4 = vpack.c.bf16 %v24_v3, %v23_v2  ;;  %v27_v7 = vld [vmem:[%s568_s0 + $0x20] sm:$0xff]  ;;  %v28_v8 = vld [vmem:[%s568_s0 + $0x28] sm:$0xff]  ;;  %v40_v9 = vpack.c.bf16 %v26_v6, %v25_v5 }
   0x4   :  { %336 = vmatprep.subr.bf16.mxu0 %v418_v1  ;;  %v41_v10 = vpack.c.bf16 %v28_v8, %v27_v7 }
   0x5   :  { %338 = vmatprep.mubr.msk.bf16.mxu0 %vm70_vm0, %v39_v4 }
   0x7   :  { %337 = vmatpush3.bf16.msra.mxu0 %v418_v1 }
   0x8   :  { %11 = vsyncpa [#allocation4], 0  ;;  %v29_v11 = vld [vmem:[%s568_s0 + $0x30] sm:$0xff]  ;;  %v30_v12 = vld [vmem:[%s568_s0 + $0x38] sm:$0xff]  ;;  %v443_v26 = vmov 0.0|0.0   ;;  %vm444_vm1 = vmmov 0  }
   0x9   :  { %v31_v13 = vld [vmem:[%s568_s0 + $0x40] sm:$0xff]  ;;  %v32_v14 = vld [vmem:[%s568_s0 + $0x48] sm:$0xff]  ;;  %v42_v15 = vpack.c.bf16 %v30_v12, %v29_v11  ;;  %v33_v17 = vld [vmem:[%s568_s0 + $0x50] sm:$0xff]  ;;  %389 = vmatprep.subr.bf16.mxu1 %v443_v26  ;;  %v445_v27 = vmov 0.0   ;;  %s446_s6 = smov [#allocation3]  }
   0xa   :  { %339 = vmatmul.mubr.msk.bf16.vlgmr.msra.gmra.mrb[0].mxu0 %vm70_vm0, %v40_v9  ;;  %v43_v16 = vpack.c.bf16 %v32_v14, %v31_v13  ;;  %v34_v18 = vld [vmem:[%s568_s0 + $0x58] sm:$0xff]  ;;  %v35_v19 = vld [vmem:[%s568_s0 + $0x60] sm:$0xff]  ;;  %v36_v20 = vld [vmem:[%s568_s0 + $0x68] sm:$0xff]  ;;  %386 = vmatprep.mubr.msk.f32.mxu1 %vm444_vm1, %v445_v27  ;;  %s288_s7 = sshll.u32 %s446_s6, 4  ;;  %s289_s7 = int_to_ptr.vmem [resolvable:$true] %s288_s7 }
   0xb   :  { %342 = vmatprep.mubr.msk.bf16.mxu0 %vm70_vm0, %v41_v10  ;;  %v44_v21 = vpack.c.bf16 %v34_v18, %v33_v17  ;;  %v45_v22 = vpack.c.bf16 %v36_v20, %v35_v19  ;;  %v37_v23 = vld [vmem:[%s568_s0 + $0x70] sm:$0xff]  ;;  %v38_v24 = vld [vmem:[%s568_s0 + $0x78] sm:$0xff]  ;;  %v296_v28 = vld [vmem:[%s570_s2] ss:$0 sm:$0xff]  ;;  %s419_s8 = scalar_lea.vmem %s289_s7, 16  ;;  %s423_s9 = scalar_lea.vmem %s289_s7, 32 }
   0xc   :  { %v46_v25 = vpack.c.bf16 %v38_v24, %v37_v23  ;;  %p420_p0 = scmp.ne.s32.totalorder %s289_s7, %s419_s8  ;;  %p424_p1 = scmp.lt.s32.totalorder %s289_s7, %s289_s7 }
   0xd   :  { %p425_p2 = scmp.lt.s32.totalorder %s423_s9, %s419_s8 }
   0xf   :  { %p426_p3 = por %p425_p2, %p424_p1 }
  0x11   :  { %p427_p4 = pnand %p426_p3, %p420_p0 }
  0x12   :  { %343 = vmatmul.mubr.msk.bf16.gmra.mrb[4].mxu0 %vm70_vm0, %v42_v15 }
  0x13   :  { %346 = vmatprep.mubr.msk.bf16.mxu0 %vm70_vm0, %v43_v16 }
  0x1a   :  { %347 = vmatmul.mubr.msk.bf16.gmra.mrb[8].mxu0 %vm70_vm0, %v44_v21  ;;  %v208_v21 = vld [vmem:[%s571_s3] sm:$0x1] }
  0x1b   :  { %350 = vmatprep.mubr.msk.bf16.mxu0 %vm70_vm0, %v45_v22  ;;  %v210_v22 = vstv %s572_s4 }
  0x22   :  { %351 = vmatmul.mubr.msk.bf16.gmra.mrb[12].mxu0 %vm70_vm0, %v46_v25 }
  0xdd   :  { %v340_v29 = vpop.f32.mrb[0].mxu0 }
  0xde   :  { %v138_v30 = vadd.f32 %v340_v29, %v296_v28  ;;  %v129_v31 = vpop.f32.mrb[1].mxu0 }
  0xdf   :  { %v130_v32 = vadd.f32 %v296_v28, %v129_v31  ;;  %v341_v33 = vpop.f32.mrb[2].mxu0 }
  0xe0   :  { %v141_v34 = vadd.f32 %v341_v33, %v296_v28  ;;  %v132_v35 = vpop.f32.mrb[3].mxu0  ;;  %v194_v37 = vmax.f32 %v138_v30, 0.0 }
  0xe1   :  { %v133_v36 = vadd.f32 %v296_v28, %v132_v35  ;;  %v192_v39 = vmax.f32 %v130_v32, 0.0 }
  0xe2   :  { %v195_v38 = vmax.f32 %v141_v34, 0.0 }
  0xe3   :  { %v193_v40 = vmax.f32 %v133_v36, 0.0 }
  0xe4   :  { %v393_v41 = vpack.c.bf16 %v195_v38, %v194_v37 }
  0xe5   :  { %v390_v42 = vpack.c.bf16 %v193_v40, %v192_v39  ;;  %v344_v43 = vpop.f32.mrb[4].mxu0 }
  0xe6   :  { %v154_v44 = vadd.f32 %v344_v43, %v296_v28  ;;  %v145_v45 = vpop.f32.mrb[5].mxu0 }
  0xe7   :  { %391 = vmatpush3.bf16.xpose.msra.mxu1 %v390_v42  ;;  %v146_v46 = vadd.f32 %v296_v28, %v145_v45  ;;  %v345_v47 = vpop.f32.mrb[6].mxu0 }
  0xe8   :  { %v198_v48 = vmax.f32 %v154_v44, 0.0  ;;  %v157_v49 = vadd.f32 %v345_v47, %v296_v28  ;;  %v148_v50 = vpop.f32.mrb[7].mxu0  ;;  %392 = vmatprep.subr.bf16.mxu1 %v443_v26 }
  0xe9   :  { %v196_v51 = vmax.f32 %v146_v46, 0.0  ;;  %v149_v52 = vadd.f32 %v296_v28, %v148_v50 }
  0xea   :  { %v199_v53 = vmax.f32 %v157_v49, 0.0 }
  0xeb   :  { %v197_v54 = vmax.f32 %v149_v52, 0.0 }
  0xec   :  { %v399_v55 = vpack.c.bf16 %v199_v53, %v198_v48 }
  0xed   :  { %v396_v56 = vpack.c.bf16 %v197_v54, %v196_v51  ;;  %v348_v57 = vpop.f32.mrb[8].mxu0 }
  0xee   :  { %v170_v58 = vadd.f32 %v348_v57, %v296_v28  ;;  %v161_v59 = vpop.f32.mrb[9].mxu0 }
  0xef   :  { %394 = vmatpush3.bf16.xpose.msra.mxu1 %v393_v41  ;;  %v162_v60 = vadd.f32 %v296_v28, %v161_v59  ;;  %v349_v61 = vpop.f32.mrb[10].mxu0 }
  0xf0   :  { %395 = vmatprep.subr.bf16.mxu1 %v443_v26  ;;  %v202_v62 = vmax.f32 %v170_v58, 0.0  ;;  %v173_v63 = vadd.f32 %v349_v61, %v296_v28  ;;  %v164_v0 = vpop.f32.mrb[11].mxu0 }
  0xf1   :  { %v200_v1 = vmax.f32 %v162_v60, 0.0  ;;  %v165_v2 = vadd.f32 %v296_v28, %v164_v0 }
  0xf2   :  { %v203_v3 = vmax.f32 %v173_v63, 0.0 }
  0xf3   :  { %v201_v4 = vmax.f32 %v165_v2, 0.0 }
  0xf4   :  { %v405_v5 = vpack.c.bf16 %v203_v3, %v202_v62 }
  0xf5   :  { %v402_v6 = vpack.c.bf16 %v201_v4, %v200_v1  ;;  %v352_v7 = vpop.f32.mrb[12].mxu0 }
  0xf6   :  { %v186_v8 = vadd.f32 %v352_v7, %v296_v28  ;;  %v177_v9 = vpop.f32.mrb[13].mxu0 }
  0xf7   :  { %397 = vmatpush3.bf16.xpose.msra.mxu1 %v396_v56  ;;  %v178_v10 = vadd.f32 %v296_v28, %v177_v9  ;;  %v353_v11 = vpop.f32.mrb[14].mxu0 }
  0xf8   :  { %398 = vmatprep.subr.bf16.mxu1 %v443_v26  ;;  %v206_v12 = vmax.f32 %v186_v8, 0.0  ;;  %v189_v13 = vadd.f32 %v353_v11, %v296_v28  ;;  %v180_v14 = vpop.f32.mrb[15].mxu0 }
  0xf9   :  { %v204_v15 = vmax.f32 %v178_v10, 0.0  ;;  %v181_v16 = vadd.f32 %v296_v28, %v180_v14 }
  0xfa   :  { %v207_v17 = vmax.f32 %v189_v13, 0.0 }
  0xfb   :  { %v205_v18 = vmax.f32 %v181_v16, 0.0 }
  0xfc   :  { %v411_v19 = vpack.c.bf16 %v207_v17, %v206_v12 }
  0xfd   :  { %v408_v20 = vpack.c.bf16 %v205_v18, %v204_v15 }
  0xff   :  { %400 = vmatpush3.bf16.xpose.msra.mxu1 %v399_v55 }
 0x100   :  { %401 = vmatprep.subr.bf16.mxu1 %v443_v26 }
 0x107   :  { %403 = vmatpush3.bf16.xpose.msra.mxu1 %v402_v6 }
 0x108   :  { %404 = vmatprep.subr.bf16.mxu1 %v443_v26 }
 0x10f   :  { %406 = vmatpush3.bf16.xpose.msra.mxu1 %v405_v5 }
 0x110   :  { %407 = vmatprep.subr.bf16.mxu1 %v443_v26 }
 0x117   :  { %409 = vmatpush3.bf16.xpose.msra.mxu1 %v408_v20 }
 0x118   :  { %410 = vmatprep.subr.bf16.mxu1 %v443_v26 }
 0x11f   :  { %412 = vmatpush3.bf16.xpose.msra.mxu1 %v411_v19 }
 0x126   :  { %387 = vmatmul.mubr.f32.vlgmr.msra.gmra.mrb[0].mxu1 %v208_v21 }
 0x1f9   :  { %v277_v23 = vpop.f32.mrb[0].mxu1 }
 0x1fa   :  { %v278_v24 = vadd.f32 %v277_v23, %v210_v22  ;;  %v388_v25 = vpop.f32.mrb[1].mxu1 }
 0x1fc   :  { %281 = vst [vmem:[#allocation3] sm:$0x1] %v278_v24 }
 0x1fd   :  { %430 = shalt.err (!%p427_p4)
}
 0x1fe   :  { %s431_s11 = scalar_lea.hbm %s573_s5, 16 }
 0x1ff   :  { %p432_p5 = scmp.ne.s32.totalorder %s573_s5, %s431_s11  ;;  %p435_p6 = scmp.lt.u32.totalorder %s431_s11, %s573_s5 }
 0x201   :  { %p437_p7 = pnand %p435_p6, %p432_p5 }
 0x203   :  { %440 = shalt.err (!%p437_p7)
}
 0x204   :  { %291 = dma.vmem_to_hbm [thread:$0]  %s289_s7, 16, %s573_s5, [#allocation4]  }
 0x205   :  { %441 = dma.done.wait [#allocation4], 16  }
 0x206   :  { %442 = vsyncadd [#allocation4], 4294967280 }
 0x207   :  { %295 = vsyncpa [#allocation4], 1 }

</bundles_post_ra>
